<compile_context>
chip_gen: v5e
topology: v5e:2x2
jax: 0.10.0
libtpu: 0.0.40
codegen_flags: <defaults>
</compile_context>

<pallas_src>
import functools
import math

import jax
import jax.numpy as jnp
import numpy as np
from jax.experimental import pallas as pl
from jax.experimental.pallas import tpu as pltpu


def _cdiv(a, b):
    return (a + b - 1) // b


def _round_up(x, m):
    return ((x + m - 1) // m) * m


def _vmem_capacity_bytes():
    try:
        return int(pltpu.get_tpu_info().vmem_capacity_bytes)
    except Exception:
        return 64 * 1024 * 1024  # conservative (v7x per-core VMEM)


def _fused_vmem_bytes(tm, D, tf, bx, bw, bo, use_scratch):
    """Per-step VMEM footprint of the fused kernel: double-buffered blocks,
    the (tm, tf) f32 hidden temporary, biases, optional f32 accumulator and
    Mosaic internal-scratch headroom."""
    b32 = 4
    total = (2 * tm * D * bx        # x row tile (double buffered)
             + 2 * D * tf * bw      # W1 column tile
             + 2 * tf * D * bw      # W2 row tile
             + 2 * tf * b32         # b1 tile
             + 2 * D * b32          # b2
             + 2 * tm * D * bo      # output tile
             + tm * tf * b32)       # relu(x@W1+b1) temporary (f32)
    if use_scratch:
        total += tm * D * b32       # f32 accumulator scratch
    return total + (2 << 20)        # Mosaic internal scratch headroom


# ----------------------------------------------------------------------------
# Fused FFN kernels:  out = relu(x @ W1 + b1) @ W2 + b2
#   grid = (cdiv(M, tm), Fp // tf);  d_ff axis is the reduction ("arbitrary").
# ----------------------------------------------------------------------------
def _ffn_fused_kernel_f32out(x_ref, w1_ref, b1_ref, w2_ref, b2_ref, o_ref):
    """f32 output: accumulate directly into the resident output block."""
    j = pl.program_id(1)

    h = jnp.dot(x_ref[...], w1_ref[...], preferred_element_type=jnp.float32)
    h = jnp.maximum(h + b1_ref[...], 0.0)
    # TODO(synk): training-mode dropout on h is identity (eval mode).
    contrib = jnp.dot(h.astype(w2_ref.dtype), w2_ref[...],
                      preferred_element_type=jnp.float32)

    @pl.when(j == 0)
    def _():
        o_ref[...] = contrib + b2_ref[...]

    @pl.when(j != 0)
    def _():
        o_ref[...] += contrib


def _ffn_fused_kernel_scratch(x_ref, w1_ref, b1_ref, w2_ref, b2_ref, o_ref,
                              acc_ref):
    """Non-f32 output: accumulate in f32 VMEM scratch, cast on the last step."""
    j = pl.program_id(1)

    @pl.when(j == 0)
    def _():
        acc_ref[...] = jnp.zeros_like(acc_ref)

    h = jnp.dot(x_ref[...], w1_ref[...], preferred_element_type=jnp.float32)
    h = jnp.maximum(h + b1_ref[...], 0.0)
    # TODO(synk): training-mode dropout on h is identity (eval mode).
    acc_ref[...] += jnp.dot(h.astype(w2_ref.dtype), w2_ref[...],
                            preferred_element_type=jnp.float32)

    @pl.when(j == pl.num_programs(1) - 1)
    def _():
        o_ref[...] = (acc_ref[...] + b2_ref[...]).astype(o_ref.dtype)


def pallas_ffn_fused(x, w1_t, b1, w2_t, b2, *, tm=256, tf=None,
                     out_dtype=None, vmem_budget=None):
    """x: [M, D], w1_t: [D, Fp], b1: [1, Fp] f32, w2_t: [Fp, D], b2: [1, D] f32.
    Fp (padded d_ff) must be a multiple of the chosen tf."""
    M, D = x.shape
    Fp = w1_t.shape[1]
    out_dtype = out_dtype or x.dtype
    use_scratch = out_dtype != jnp.float32

    bx = jnp.dtype(x.dtype).itemsize
    bw = jnp.dtype(w1_t.dtype).itemsize
    bo = jnp.dtype(out_dtype).itemsize

    cap = _vmem_capacity_bytes()
    budget = vmem_budget if vmem_budget is not None else int(cap * 0.70)

    # --- M tiling: no activation padding; Pallas masks the partial block. ---
    tm = min(tm, M)
    if tm == M and M >= 256:
        # keep >= 2 blocks on the "parallel" M axis so both v7x TCs get work
        tm = _round_up(_cdiv(M, 2), 128)
    grid_m = _cdiv(M, tm)

    # --- F (reduction) tiling: prefer tf == Fp -> weights DMA'd once and
    #     held resident across every M row tile. ----------------------------
    if tf is None:
        tf = 128
        for cand in range(128, Fp + 1, 128):
            if Fp % cand == 0 and _fused_vmem_bytes(
                    tm, D, cand, bx, bw, bo, use_scratch) <= budget:
                tf = cand
    tf = min(tf, Fp)
    assert Fp % tf == 0, "reduction tile tf must divide the padded d_ff"

    est = _fused_vmem_bytes(tm, D, tf, bx, bw, bo, use_scratch)
    vmem_limit = int(min(cap * 0.98, max(est + (8 << 20), 32 << 20)))

    if use_scratch:
        kernel = _ffn_fused_kernel_scratch
        scratch = [pltpu.VMEM((tm, D), jnp.float32)]
    else:
        kernel = _ffn_fused_kernel_f32out
        scratch = []

    return pl.pallas_call(
        kernel,
        out_shape=jax.ShapeDtypeStruct((M, D), out_dtype),
        grid_spec=pltpu.PrefetchScalarGridSpec(
            num_scalar_prefetch=0,
            grid=(grid_m, Fp // tf),
            in_specs=[
                pl.BlockSpec((tm, D), lambda i, j: (i, 0)),   # x row tile
                pl.BlockSpec((D, tf), lambda i, j: (0, j)),   # W1 column tile
                pl.BlockSpec((1, tf), lambda i, j: (0, j)),   # b1 tile
                pl.BlockSpec((tf, D), lambda i, j: (j, 0)),   # W2 row tile
                pl.BlockSpec((1, D), lambda i, j: (0, 0)),    # b2
            ],
            out_specs=pl.BlockSpec((tm, D), lambda i, j: (i, 0)),
            scratch_shapes=scratch,
        ),
        compiler_params=pltpu.CompilerParams(
            dimension_semantics=("parallel", "arbitrary"),
            vmem_limit_bytes=vmem_limit),
    )(x, w1_t, b1, w2_t, b2)


# ----------------------------------------------------------------------------
# Fallback: generic tiled linear  y = act(x @ W + b)   (rare: huge d_model)
# ----------------------------------------------------------------------------
def _tiled_linear_kernel(x_ref, w_ref, b_ref, o_ref, acc_ref, *, apply_relu):
    k = pl.program_id(2)

    @pl.when(k == 0)
    def _():
        acc_ref[...] = jnp.zeros_like(acc_ref)

    acc_ref[...] += jnp.dot(x_ref[...], w_ref[...],
                            preferred_element_type=jnp.float32)

    @pl.when(k == pl.num_programs(2) - 1)
    def _():
        y = acc_ref[...] + b_ref[...]
        if apply_relu:
            y = jnp.maximum(y, 0.0)
        o_ref[...] = y.astype(o_ref.dtype)


def pallas_linear(x, w_t, b, *, apply_relu=False, out_dtype=None,
                  tm=256, tn=256, tk=512):
    """x: [M, K], w_t: [K, N] (pre-transposed), b: [1, N] f32 -> [M, N]."""
    M, K = x.shape
    Kw, N = w_t.shape
    assert K == Kw and b.shape == (1, N)
    out_dtype = out_dtype or x.dtype

    tm = min(tm, M)
    tn = min(tn, N)
    tk = min(tk, K)
    Np, Kp = _round_up(N, tn), _round_up(K, tk)

    # K is the reduction axis -> must be explicitly zero-padded.  M is never
    # padded (cdiv grid + partial-block masking); N pads are sliced off.
    xp = x if Kp == K else jnp.pad(x, ((0, 0), (0, Kp - K)))
    wp = w_t if (Kp, Np) == (K, N) else jnp.pad(w_t, ((0, Kp - K), (0, Np - N)))
    bp = b if Np == N else jnp.pad(b, ((0, 0), (0, Np - N)))

    bx = jnp.dtype(xp.dtype).itemsize
    bw = jnp.dtype(wp.dtype).itemsize
    bo = jnp.dtype(out_dtype).itemsize
    cap = _vmem_capacity_bytes()
    est = (2 * tm * tk * bx + 2 * tk * tn * bw + 2 * tn * 4
           + 2 * tm * tn * bo + tm * tn * 4) + (2 << 20)
    vmem_limit = int(min(cap * 0.98, max(est + (8 << 20), 32 << 20)))

    grid = (_cdiv(M, tm), Np // tn, Kp // tk)
    kernel = functools.partial(_tiled_linear_kernel, apply_relu=apply_relu)

    out = pl.pallas_call(
        kernel,
        out_shape=jax.ShapeDtypeStruct((M, Np), out_dtype),
        grid_spec=pltpu.PrefetchScalarGridSpec(
            num_scalar_prefetch=0,
            grid=grid,
            in_specs=[
                pl.BlockSpec((tm, tk), lambda i, j, k: (i, k)),
                pl.BlockSpec((tk, tn), lambda i, j, k: (k, j)),
                pl.BlockSpec((1, tn), lambda i, j, k: (0, j)),
            ],
            out_specs=pl.BlockSpec((tm, tn), lambda i, j, k: (i, j)),
            scratch_shapes=[pltpu.VMEM((tm, tn), jnp.float32)],
        ),
        compiler_params=pltpu.CompilerParams(
            dimension_semantics=("parallel", "parallel", "arbitrary"),
            vmem_limit_bytes=vmem_limit),
    )(xp, wp, bp)

    return out[:, :N] if Np != N else out


# ----------------------------------------------------------------------------
# Parameters
# ----------------------------------------------------------------------------
def init_params(key, d_model, d_ff):
    """nn.Linear-style uniform init; weights stored pre-transposed [in, out]."""
    k1, k2, k3, k4 = jax.random.split(key, 4)
    b1_bound = 1.0 / math.sqrt(d_model)   # fan_in of w_1
    b2_bound = 1.0 / math.sqrt(d_ff)      # fan_in of w_2
    return {
        "w1_t": jax.random.uniform(k1, (d_model, d_ff), jnp.float32,
                                   -b1_bound, b1_bound),
        "b1": jax.random.uniform(k2, (d_ff,), jnp.float32, -b1_bound, b1_bound),
        "w2_t": jax.random.uniform(k3, (d_ff, d_model), jnp.float32,
                                   -b2_bound, b2_bound),
        "b2": jax.random.uniform(k4, (d_model,), jnp.float32,
                                 -b2_bound, b2_bound),
    }


def prepare_ffn_params(params, *, compute_dtype=jnp.bfloat16):
    """One-time prep (NOT per forward): pad d_ff to a multiple of 128 and cast
    the matmul operands to the MXU compute dtype.  Zero F-pads are exact
    through bias + ReLU + W2 (they contribute 0)."""
    D, F = params["w1_t"].shape
    Fp = _round_up(F, 128)
    w1, b1, w2 = params["w1_t"], params["b1"], params["w2_t"]
    if Fp != F:
        w1 = jnp.pad(w1, ((0, 0), (0, Fp - F)))
        b1 = jnp.pad(b1, (0, Fp - F))
        w2 = jnp.pad(w2, ((0, Fp - F), (0, 0)))
    return {
        "w1_t": w1.astype(compute_dtype),
        "b1": b1.astype(jnp.float32).reshape(1, Fp),
        "w2_t": w2.astype(compute_dtype),
        "b2": params["b2"].astype(jnp.float32).reshape(1, D),
    }


# ----------------------------------------------------------------------------
# PositionwiseFeedForward forward
# ----------------------------------------------------------------------------
def positionwise_feed_forward(prepared, x, *, fuse=None, tm=256, tf=None,
                              tn=256, tk=512):
    """x: [B, S, d_model] -> [B, S, d_model].  Dropout = identity (eval)."""
    B, S, D = x.shape
    Fp = prepared["w1_t"].shape[1]
    compute_dtype = prepared["w1_t"].dtype
    out_dtype = x.dtype

    M = B * S
    x2 = x.reshape(M, D).astype(compute_dtype)

    bx = bw = jnp.dtype(compute_dtype).itemsize
    bo = jnp.dtype(out_dtype).itemsize
    budget = int(_vmem_capacity_bytes() * 0.70)

    if fuse is None:
        # fused path is viable whenever even the smallest F tile fits VMEM
        fuse = _fused_vmem_bytes(min(tm, M), D, 128, bx, bw, bo,
                                 out_dtype != jnp.float32) <= budget

    if fuse:
        y = pallas_ffn_fused(x2, prepared["w1_t"], prepared["b1"],
                             prepared["w2_t"], prepared["b2"],
                             tm=tm, tf=tf, out_dtype=out_dtype,
                             vmem_budget=budget)
    else:
        # TODO(synk): a 3-D fused kernel tiling W2's output columns would keep
        # even huge d_model out of this (M, d_ff) HBM round trip.
        h = pallas_linear(x2, prepared["w1_t"], prepared["b1"],
                          apply_relu=True, out_dtype=compute_dtype,
                          tm=tm, tn=tn, tk=min(tk, 512))
        # TODO(synk): training-mode dropout on h is identity (eval mode).
        y = pallas_linear(h, prepared["w2_t"], prepared["b2"],
                          apply_relu=False, out_dtype=out_dtype,
                          tm=tm, tn=tn, tk=tk)
    return y.reshape(B, S, D)


# ----------------------------------------------------------------------------
# Pure-JAX reference (mirrors the PyTorch forward, dropout = identity)
# ----------------------------------------------------------------------------
def reference_ffn(params, x):
    h = jnp.maximum(x @ params["w1_t"] + params["b1"], 0.0)
    return h @ params["w2_t"] + params["b2"]


if __name__ == "__main__":
    root = jax.random.PRNGKey(0)

    # --- test 1: small shapes, fused, f32 MXU operands (exact path) --------
    B, S, d_model, d_ff = 2, 8, 32, 64
    kp, kx = jax.random.split(root)
    params = init_params(kp, d_model, d_ff)
    x = jax.random.normal(kx, (B, S, d_model), jnp.float32)
    ref = reference_ffn(params, x)

    prep_f32 = prepare_ffn_params(params, compute_dtype=jnp.float32)
    out = jax.block_until_ready(positionwise_feed_forward(prep_f32, x, fuse=True))
    np.testing.assert_allclose(np.asarray(out), np.asarray(ref),
                               rtol=1e-5, atol=1e-5)

    # --- test 2: same shapes, default bf16 MXU operands --------------------
    prep_bf16 = prepare_ffn_params(params)
    out_bf = jax.block_until_ready(positionwise_feed_forward(prep_bf16, x))
    np.testing.assert_allclose(np.asarray(out_bf), np.asarray(ref),
                               rtol=3e-2, atol=3e-2)

    # --- test 3: bf16 activations in/out (exercises the scratch-acc kernel)
    out_xb = jax.block_until_ready(
        positionwise_feed_forward(prep_bf16, x.astype(jnp.bfloat16)))
    np.testing.assert_allclose(np.asarray(out_xb.astype(jnp.float32)),
                               np.asarray(ref), rtol=5e-2, atol=5e-2)

    # --- test 4: larger shapes, multi-tile M grid and multi-step F reduction
    B2, S2, dm2, dff2 = 2, 16, 384, 512
    kp2, kx2 = jax.random.split(jax.random.PRNGKey(1))
    params2 = init_params(kp2, dm2, dff2)
    x2 = jax.random.normal(kx2, (B2, S2, dm2), jnp.float32)
    ref2 = reference_ffn(params2, x2)

    prep2_f32 = prepare_ffn_params(params2, compute_dtype=jnp.float32)
    out2 = jax.block_until_ready(
        positionwise_feed_forward(prep2_f32, x2, fuse=True, tm=16, tf=256))
    np.testing.assert_allclose(np.asarray(out2), np.asarray(ref2),
                               rtol=1e-4, atol=1e-4)

    prep2_bf16 = prepare_ffn_params(params2)
    out2_bf = jax.block_until_ready(
        positionwise_feed_forward(prep2_bf16, x2, tm=16, tf=256))
    np.testing.assert_allclose(np.asarray(out2_bf), np.asarray(ref2),
                               rtol=4e-2, atol=4e-2)

    # --- test 5: two-pass tiled fallback path (bf16 intermediate h) --------
    out2_fb = jax.block_until_ready(
        positionwise_feed_forward(prep2_bf16, x2, fuse=False,
                                  tm=32, tn=256, tk=256))
    np.testing.assert_allclose(np.asarray(out2_fb), np.asarray(ref2),
                               rtol=4e-2, atol=4e-2)

    print("KERNEL_OK")
</pallas_src>

<mosaic_0001>
module attributes {stable_mosaic.version = 11 : i64} {
  func.func @_ffn_fused_kernel_f32out(%arg0: i32, %arg1: i32, %arg2: memref<16x32xf32, #tpu.memory_space<vmem>>, %arg3: memref<32x128xf32, #tpu.memory_space<vmem>>, %arg4: memref<1x128xf32, #tpu.memory_space<vmem>>, %arg5: memref<128x32xf32, #tpu.memory_space<vmem>>, %arg6: memref<1x32xf32, #tpu.memory_space<vmem>>, %arg7: memref<16x32xf32, #tpu.memory_space<vmem>>) attributes {dimension_semantics = [#tpu.dimension_semantics<parallel>, #tpu.dimension_semantics<arbitrary>], iteration_bounds = array<i64: 1, 1>, scalar_prefetch = 0 : i64, scratch_operands = 0 : i64, tpu.core_type = #tpu.core_type<tc>, window_params = [{transform_indices = @transform_0, window_bounds = array<i64: 16, 32>}, {transform_indices = @transform_1, window_bounds = array<i64: 32, 128>}, {transform_indices = @transform_2, window_bounds = array<i64: 1, 128>}, {transform_indices = @transform_3, window_bounds = array<i64: 128, 32>}, {pipeline_mode = #tpu.pipeline_mode<synchronous>, transform_indices = @transform_4, window_bounds = array<i64: 1, 32>}, {transform_indices = @transform_5, window_bounds = array<i64: 16, 32>}]} {
    %c0 = arith.constant 0 : index
    %c0_0 = arith.constant 0 : index
    %0 = vector.load %arg2[%c0, %c0_0] : memref<16x32xf32, #tpu.memory_space<vmem>>, vector<16x32xf32>
    %c0_1 = arith.constant 0 : index
    %c0_2 = arith.constant 0 : index
    %1 = vector.load %arg3[%c0_1, %c0_2] : memref<32x128xf32, #tpu.memory_space<vmem>>, vector<32x128xf32>
    %cst = arith.constant dense<0.000000e+00> : vector<16x128xf32>
    %2 = tpu.matmul %0, %1, %cst {dimension_numbers = #tpu.dot_dimension_numbers<[1], [0], [0], [1], [0, 0, 1, 1], [], []>} : vector<16x32xf32>, vector<32x128xf32>, vector<16x128xf32> -> vector<16x128xf32>
    %c0_3 = arith.constant 0 : index
    %c0_4 = arith.constant 0 : index
    %3 = vector.load %arg4[%c0_3, %c0_4] : memref<1x128xf32, #tpu.memory_space<vmem>>, vector<1x128xf32>
    %4 = vector.broadcast %3 : vector<1x128xf32> to vector<16x128xf32>
    %5 = arith.addf %2, %4 : vector<16x128xf32>
    %cst_5 = arith.constant 0.000000e+00 : f32
    %6 = vector.broadcast %cst_5 : f32 to vector<16x128xf32>
    %7 = arith.maximumf %5, %6 : vector<16x128xf32>
    %c0_6 = arith.constant 0 : index
    %c0_7 = arith.constant 0 : index
    %8 = vector.load %arg5[%c0_6, %c0_7] : memref<128x32xf32, #tpu.memory_space<vmem>>, vector<128x32xf32>
    %cst_8 = arith.constant dense<0.000000e+00> : vector<16x32xf32>
    %9 = tpu.matmul %7, %8, %cst_8 {dimension_numbers = #tpu.dot_dimension_numbers<[1], [0], [0], [1], [0, 0, 1, 1], [], []>} : vector<16x128xf32>, vector<128x32xf32>, vector<16x32xf32> -> vector<16x32xf32>
    %c0_i32 = arith.constant 0 : i32
    %10 = arith.cmpi eq, %arg1, %c0_i32 : i32
    %11 = arith.extui %10 : i1 to i32
    %c0_i32_9 = arith.constant 0 : i32
    %12 = arith.cmpi ne, %11, %c0_i32_9 : i32
    scf.if %12 {
      %c0_12 = arith.constant 0 : index
      %c0_13 = arith.constant 0 : index
      %16 = vector.load %arg6[%c0_12, %c0_13] : memref<1x32xf32, #tpu.memory_space<vmem>>, vector<1x32xf32>
      %17 = vector.broadcast %16 : vector<1x32xf32> to vector<16x32xf32>
      %18 = arith.addf %9, %17 : vector<16x32xf32>
      %c0_14 = arith.constant 0 : index
      %c0_15 = arith.constant 0 : index
      %19 = vector.load %arg7[%c0_14, %c0_15] : memref<16x32xf32, #tpu.memory_space<vmem>>, vector<16x32xf32>
      tpu.vector_store %arg7[%c0_14, %c0_15], %18 {strides = array<i32>} : memref<16x32xf32, #tpu.memory_space<vmem>>, vector<16x32xf32>,
    } else {
    }
    %c0_i32_10 = arith.constant 0 : i32
    %13 = arith.cmpi ne, %arg1, %c0_i32_10 : i32
    %14 = arith.extui %13 : i1 to i32
    %c0_i32_11 = arith.constant 0 : i32
    %15 = arith.cmpi ne, %14, %c0_i32_11 : i32
    scf.if %15 {
      %c0_12 = arith.constant 0 : index
      %c0_13 = arith.constant 0 : index
      %16 = vector.load %arg7[%c0_12, %c0_13] : memref<16x32xf32, #tpu.memory_space<vmem>>, vector<16x32xf32>
      %17 = arith.addf %16, %9 : vector<16x32xf32>
      %c0_14 = arith.constant 0 : index
      %c0_15 = arith.constant 0 : index
      %18 = vector.load %arg7[%c0_14, %c0_15] : memref<16x32xf32, #tpu.memory_space<vmem>>, vector<16x32xf32>
      tpu.vector_store %arg7[%c0_14, %c0_15], %17 {strides = array<i32>} : memref<16x32xf32, #tpu.memory_space<vmem>>, vector<16x32xf32>,
    } else {
    }
    return
  }
  func.func @transform_0(%arg0: i32, %arg1: i32) -> (i32, i32) {
    %c0_i32 = arith.constant 0 : i32
    %c0_i32_0 = arith.constant 0 : i32
    return %arg0, %c0_i32 : i32, i32
  }
  func.func @transform_1(%arg0: i32, %arg1: i32) -> (i32, i32) {
    %c0_i32 = arith.constant 0 : i32
    %c0_i32_0 = arith.constant 0 : i32
    return %c0_i32, %arg1 : i32, i32
  }
  func.func @transform_2(%arg0: i32, %arg1: i32) -> (i32, i32) {
    %c0_i32 = arith.constant 0 : i32
    %c0_i32_0 = arith.constant 0 : i32
    return %c0_i32, %arg1 : i32, i32
  }
  func.func @transform_3(%arg0: i32, %arg1: i32) -> (i32, i32) {
    %c0_i32 = arith.constant 0 : i32
    %c0_i32_0 = arith.constant 0 : i32
    return %arg1, %c0_i32 : i32, i32
  }
  func.func @transform_4(%arg0: i32, %arg1: i32) -> (i32, i32) {
    %c0_i32 = arith.constant 0 : i32
    %c0_i32_0 = arith.constant 0 : i32
    %c0_i32_1 = arith.constant 0 : i32
    return %c0_i32, %c0_i32_0 : i32, i32
  }
  func.func @transform_5(%arg0: i32, %arg1: i32) -> (i32, i32) {
    %c0_i32 = arith.constant 0 : i32
    %c0_i32_0 = arith.constant 0 : i32
    return %arg0, %c0_i32 : i32, i32
  }
}

</mosaic_0001>

<bundles_post_ra>
// kernel: tpu_custom_call.1
= control target key start
LH: loop header
LB: loop body
LE: loop exit
PB: predicated region body
PF: predicated region fallthrough
CT: control target
= control target key end

     0   :  { %vm31_vm0 = vcmask 261120   ;;  %s303_s0 = inlined_call_operand.vmem [shape: f32[16,32], index: 0, kind: input, shape index: {}]   ;;  %s304_s1 = inlined_call_operand.vmem [shape: f32[32,128], index: 1, kind: input, shape index: {}]   ;;  %s305_s2 = inlined_call_operand.vmem [shape: f32[1,128], index: 2, kind: input, shape index: {}]   ;;  %s306_s3 = inlined_call_operand.vmem [shape: f32[128,32], index: 3, kind: input, shape index: {}]   ;;  %s307_s4 = inlined_call_operand.vmem [shape: f32[1,32], index: 4, kind: input, shape index: {}]   ;;  %s308_s5 = inlined_call_operand.hbm [shape: f32[16,32], index: 5, kind: output, shape index: {}]  }
   0x1   :  { %v26_v0 = vld [vmem:[%s304_s1 + $0x18] sm:$0xff]  ;;  %v25_v1 = vld [vmem:[%s304_s1 + $0x10] sm:$0xff]  ;;  %v24_v2 = vld [vmem:[%s304_s1 + $0x8] sm:$0xff] }
   0x2   :  { %50 = vmatpush.msra.mxu0 %v26_v0  ;;  %v78_v3 = vld [vmem:[%s306_s3 + $0x78] sm:$0xff]  ;;  %v77_v4 = vld [vmem:[%s306_s3 + $0x70] sm:$0xff]  ;;  %v23_v5 = vld [vmem:[%s304_s1] sm:$0xff] }
   0x3   :  { %79 = vmatpush.msra.mxu1 %v78_v3  ;;  %v76_v6 = vld [vmem:[%s306_s3 + $0x68] sm:$0xff]  ;;  %144 = vmatpush.msra.mxu2 %v78_v3  ;;  %v21_v7 = vld [vmem:[%s303_s0] sm:$0xff] }
   0x4   :  { %51 = vmatpush.msra.mxu0 %v25_v1  ;;  %v75_v8 = vld [vmem:[%s306_s3 + $0x60] sm:$0xff] }
   0x5   :  { %80 = vmatpush.msra.mxu1 %v77_v4  ;;  %145 = vmatpush.msra.mxu2 %v77_v4 }
   0x6   :  { %52 = vmatpush.msra.mxu0 %v24_v2 }
   0x7   :  { %81 = vmatpush.msra.mxu1 %v76_v6 }
   0x8   :  { %53 = vmatpush.msra.mxu0 %v23_v5 }
   0x9   :  { %10 = vsyncpa [#allocation3], 0  ;;  %142 = vmatmul.msk.f32.vlgmr.msra.gmra.mxu0 %vm31_vm0, %v21_v7  ;;  %v74_v9 = vld [vmem:[%s306_s3 + $0x58] sm:$0xff]  ;;  %146 = vmatpush.msra.mxu2 %v76_v6  ;;  %v73_v10 = vld [vmem:[%s306_s3 + $0x50] sm:$0xff]  ;;  %s130_s15 = sshll.u32 %s308_s5, 4  ;;  %s192_s16 = smov 128   ;;  %s131_s15 = int_to_ptr.hbm [resolvable:$true] %s130_s15 }
   0xa   :  { %82 = vmatpush.msra.mxu1 %v75_v8  ;;  %v72_v11 = vld [vmem:[%s306_s3 + $0x48] sm:$0xff]  ;;  %v71_v13 = vld [vmem:[%s306_s3 + $0x40] sm:$0xff]  ;;  %v70_v14 = vld [vmem:[%s306_s3 + $0x38] sm:$0xff]  ;;  %s193_s17 = smov 8  }
   0xb   :  { %147 = vmatpush.msra.mxu2 %v75_v8  ;;  %v22_v12 = vld [vmem:[%s303_s0 + $0x8] sm:$0xff]  ;;  %v69_v15 = vld [vmem:[%s306_s3 + $0x30] sm:$0xff]  ;;  %v67_v17 = vld [vmem:[%s306_s3 + $0x20] sm:$0xff] }
   0xc   :  { %83 = vmatpush.msra.mxu1 %v74_v9  ;;  %v68_v16 = vld [vmem:[%s306_s3 + $0x28] sm:$0xff]  ;;  %v66_v18 = vld [vmem:[%s306_s3 + $0x18] sm:$0xff]  ;;  %v65_v19 = vld [vmem:[%s306_s3 + $0x10] sm:$0xff] }
   0xd   :  { %148 = vmatpush.msra.mxu2 %v74_v9  ;;  %v64_v20 = vld [vmem:[%s306_s3 + $0x8] sm:$0xff]  ;;  %v63_v21 = vld [vmem:[%s306_s3] sm:$0xff]  ;;  %s191_s3 = smov [#allocation2]  }
   0xe   :  { %84 = vmatpush.msra.mxu1 %v73_v10  ;;  %v163_v22 = vld [vmem:[%s305_s2] ss:$0 sm:$0xff]  ;;  %s128_s13 = sshll.u32 %s191_s3, 4  ;;  %s129_s13 = int_to_ptr.vmem [resolvable:$true] %s128_s13 }
   0xf   :  { %149 = vmatpush.msra.mxu2 %v73_v10  ;;  %v164_v29 = vld [vmem:[%s307_s4] ss:$0 sm:$0xff] }
  0x10   :  { %85 = vmatpush.msra.mxu1 %v72_v11 }
  0x11   :  { %143 = vmatmul.msk.f32.gmra.mxu0 %vm31_vm0, %v22_v12  ;;  %150 = vmatpush.msra.mxu2 %v72_v11 }
  0x12   :  { %86 = vmatpush.msra.mxu1 %v71_v13 }
  0x13   :  { %151 = vmatpush.msra.mxu2 %v71_v13 }
  0x14   :  { %87 = vmatpush.msra.mxu1 %v70_v14 }
  0x15   :  { %152 = vmatpush.msra.mxu2 %v70_v14 }
  0x16   :  { %88 = vmatpush.msra.mxu1 %v69_v15 }
  0x17   :  { %153 = vmatpush.msra.mxu2 %v69_v15 }
  0x18   :  { %89 = vmatpush.msra.mxu1 %v68_v16 }
  0x19   :  { %154 = vmatpush.msra.mxu2 %v68_v16 }
  0x1a   :  { %90 = vmatpush.msra.mxu1 %v67_v17 }
  0x1b   :  { %155 = vmatpush.msra.mxu2 %v67_v17 }
  0x1c   :  { %91 = vmatpush.msra.mxu1 %v66_v18 }
  0x1d   :  { %156 = vmatpush.msra.mxu2 %v66_v18 }
  0x1e   :  { %92 = vmatpush.msra.mxu1 %v65_v19 }
  0x1f   :  { %157 = vmatpush.msra.mxu2 %v65_v19 }
  0x20   :  { %93 = vmatpush.msra.mxu1 %v64_v20 }
  0x21   :  { %158 = vmatpush.msra.mxu2 %v64_v20 }
  0x22   :  { %94 = vmatpush.msra.mxu1 %v63_v21 }
  0x23   :  { %159 = vmatpush.msra.mxu2 %v63_v21 }
  0x86   :  { %v55_v23 = vpop.f32.mrf.mxu0 }
  0x87   :  { %v56_v24 = vadd.f32 %v163_v22, %v55_v23 }
  0x89   :  { %v61_v25 = vmax.f32 %v56_v24, 0.0 }
  0x8b   :  { %95 = vmatmul.f32.vlgmr.msra.gmra.mxu1 %v61_v25 }
  0x8e   :  { %v58_v26 = vpop.f32.mrf.mxu0 }
  0x8f   :  { %v59_v27 = vadd.f32 %v163_v22, %v58_v26 }
  0x91   :  { %v62_v28 = vmax.f32 %v59_v27, 0.0 }
  0x93   :  { %98 = vmatmul.f32.vlgmr.msra.gmra.mxu2 %v62_v28 }
 0x108   :  { %v96_v30 = vpop.f32.mrf.mxu1 }
 0x109   :  { %v110_v31 = vadd.f32 %v164_v29, %v96_v30 }
 0x10b   :  { %112 = vst.msk [vmem:[#allocation2] sm:$0xff] %vm31_vm0, %v110_v31 }
 0x116   :  { %v99_v32 = vpop.f32.mrf.mxu2 }
 0x117   :  { %v111_v33 = vadd.f32 %v164_v29, %v99_v32 }
 0x119   :  { %113 = vst.msk [vmem:[#allocation2 + $0x8] sm:$0xff] %vm31_vm0, %v111_v33 }
 0x11a   :  { %136 = dma.vmem_to_hbm [thread:$0]  %s129_s13, 256, %s131_s15, [#allocation3], %s192_s16, %s192_s16, %s193_s17  }
 0x11b   :  { %189 = dma.done.wait [#allocation3], 256  }
 0x11c   :  { %190 = vsyncadd [#allocation3], 4294967040 }
 0x11d   :  { %141 = vsyncpa [#allocation3], 1 }

</bundles_post_ra>
